<compile_context>
chip_gen: v7x
topology: tpu7x:2x2x1
jax: 0.10.0
libtpu: 0.0.40
codegen_flags: <defaults>
</compile_context>

<pallas_src>
import jax
import jax.numpy as jnp
from jax import lax
from jax.experimental import pallas as pl
from jax.experimental.pallas import tpu as pltpu


# ------------------------------ helpers -------------------------------------
def _round_up(x, m):
    return ((x + m - 1) // m) * m


def _choose_tm(M, cin, cout, cap=1024, budget=6 << 20):
    """Pick an M-tile: multiple of 8, <= cap, tile bytes roughly <= budget.

    Keeps (x tile + out tile + optional add tile) x double-buffering well
    under the scoped VMEM limit on all generations (v7x has only 64 MiB)."""
    per_row = (cin + 2 * cout) * 4
    tm = min(cap, max(8, budget // max(per_row, 1)))
    tm = min(tm, _round_up(M, 8))
    return max(8, (tm // 8) * 8)


# ----------------------------- 1x1 conv kernels ------------------------------
def _conv1x1_kernel(x_ref, w_ref, b_ref, o_ref):
    # x: (TM, Cin), w: (Cin, Cout), b: (1, Cout) -> o: (TM, Cout)
    o_ref[...] = (
        jnp.dot(x_ref[...], w_ref[...], preferred_element_type=jnp.float32)
        + b_ref[...]
    ).astype(o_ref.dtype)


def _conv1x1_add_kernel(x_ref, td_ref, w_ref, b_ref, o_ref):
    # Fused lateral conv + top-down add: o = x @ w + b + td
    o_ref[...] = (
        jnp.dot(x_ref[...], w_ref[...], preferred_element_type=jnp.float32)
        + b_ref[...]
        + td_ref[...]
    ).astype(o_ref.dtype)


def conv1x1(x_nhwc, w, b, add=None):
    """1x1 conv (+ optional fused elementwise add), tiled over M = N*H*W."""
    N, H, W, Cin = x_nhwc.shape
    Cout = w.shape[1]
    M = N * H * W
    x2d = x_nhwc.reshape(M, Cin)
    b2 = b.reshape(1, Cout)

    tm = _choose_tm(M, Cin, Cout)
    Mp = _round_up(M, tm)
    if Mp != M:
        x2d = jnp.pad(x2d, ((0, Mp - M), (0, 0)))

    in_specs = [pl.BlockSpec((tm, Cin), lambda i: (i, 0))]
    args = [x2d]
    kernel = _conv1x1_kernel
    if add is not None:
        a2d = add.reshape(M, Cout)
        if Mp != M:
            a2d = jnp.pad(a2d, ((0, Mp - M), (0, 0)))
        in_specs.append(pl.BlockSpec((tm, Cout), lambda i: (i, 0)))
        args.append(a2d)
        kernel = _conv1x1_add_kernel
    # weights / bias: constant index_map -> resident in VMEM across the grid.
    in_specs += [
        pl.BlockSpec((Cin, Cout), lambda i: (0, 0)),
        pl.BlockSpec((1, Cout), lambda i: (0, 0)),
    ]
    args += [w, b2]

    out = pl.pallas_call(
        kernel,
        out_shape=jax.ShapeDtypeStruct((Mp, Cout), jnp.float32),
        grid=(Mp // tm,),
        in_specs=in_specs,
        out_specs=pl.BlockSpec((tm, Cout), lambda i: (i, 0)),
        compiler_params=pltpu.CompilerParams(
            dimension_semantics=("parallel",)),
    )(*args)
    return out[:M].reshape(N, H, W, Cout)


# ----------------------------- 3x3 conv kernel -------------------------------
def _conv3x3_kernel(x0_ref, x1_ref, x2_ref, w_ref, b_ref, o_ref):
    # x{dy}: (1, 1, Wp, Cin) = padded input row h+dy (Wp = W + 2)
    # w: (3, 3, Cin, Cout) resident, b: (1, Cout) resident
    # o: (1, 1, W, Cout) = output row h
    w_out = o_ref.shape[2]
    cout = o_ref.shape[3]
    acc = jnp.zeros((w_out, cout), jnp.float32)
    for dy, xr in enumerate((x0_ref, x1_ref, x2_ref)):
        row = xr[0, 0]                      # (Wp, Cin)
        for dx in range(3):
            acc = acc + jnp.dot(
                row[dx:dx + w_out, :], w_ref[dy, dx],
                preferred_element_type=jnp.float32)
    o_ref[0, 0] = (acc + b_ref[...]).astype(o_ref.dtype)


def conv3x3(x_nhwc, w, b):
    """3x3 "same" conv.  The padded input is passed three times (same HBM
    buffer, no copy); each BlockSpec selects a dy-shifted row, so no im2col
    tensor is ever materialized and all 9 taps run inside one grid step."""
    N, H, W, Cin = x_nhwc.shape
    Cout = w.shape[3]
    Wp = W + 2
    xp = jnp.pad(x_nhwc, ((0, 0), (1, 1), (1, 1), (0, 0)))
    b2 = b.reshape(1, Cout)

    def row_spec(dy):
        return pl.BlockSpec((1, 1, Wp, Cin),
                            lambda n, h, dy=dy: (n, h + dy, 0, 0))

    out = pl.pallas_call(
        _conv3x3_kernel,
        out_shape=jax.ShapeDtypeStruct((N, H, W, Cout), jnp.float32),
        grid=(N, H),
        in_specs=[
            row_spec(0), row_spec(1), row_spec(2),
            pl.BlockSpec((3, 3, Cin, Cout), lambda n, h: (0, 0, 0, 0)),
            pl.BlockSpec((1, Cout), lambda n, h: (0, 0)),
        ],
        out_specs=pl.BlockSpec((1, 1, W, Cout), lambda n, h: (n, h, 0, 0)),
        compiler_params=pltpu.CompilerParams(
            dimension_semantics=("parallel", "parallel")),
    )(xp, xp, xp, w, b2)
    return out


# ------------------------------ glue helpers ---------------------------------
def nearest_resize(x_nhwc, out_h, out_w):
    # matches torch F.interpolate(mode='nearest'): src = floor(dst * in / out)
    # TODO(synk): gather kept in JAX glue; generating the upsampled block
    # inside the fused lateral kernel would avoid materializing it in HBM.
    in_h, in_w = x_nhwc.shape[1], x_nhwc.shape[2]
    idx_h = (jnp.arange(out_h) * in_h) // out_h
    idx_w = (jnp.arange(out_w) * in_w) // out_w
    return x_nhwc[:, idx_h][:, :, idx_w]


def init_fpn_params(key, in_channels_list, out_channels_list, mid_channels=-1):
    assert len(in_channels_list) == len(out_channels_list)
    if mid_channels <= 0:
        mid_channels = max([*in_channels_list, *out_channels_list])
    params = {"inner_w": [], "inner_b": [], "out_w": [], "out_b": [],
              "mid": mid_channels}
    for cin, cout in zip(in_channels_list, out_channels_list):
        key, k1, k2, k3, k4 = jax.random.split(key, 5)
        params["inner_w"].append(
            jax.random.normal(k1, (cin, mid_channels), jnp.float32) * 0.1)
        params["inner_b"].append(
            jax.random.normal(k2, (mid_channels,), jnp.float32) * 0.1)
        params["out_w"].append(
            jax.random.normal(k3, (3, 3, mid_channels, cout), jnp.float32) * 0.1)
        params["out_b"].append(
            jax.random.normal(k4, (cout,), jnp.float32) * 0.1)
    return params


def fpn_forward(xs_nchw, params):
    """FPN forward with Pallas kernels. Inputs/outputs are NCHW lists,
    ordered high-to-low resolution, same as the PyTorch module."""
    # TODO(synk): NCHW<->NHWC transposes kept in XLA glue at the boundary.
    xs = [jnp.transpose(x, (0, 2, 3, 1)) for x in xs_nchw]  # NCHW -> NHWC
    n = len(xs)

    last_inner = conv1x1(xs[-1], params["inner_w"][-1], params["inner_b"][-1])
    results = [conv3x3(last_inner, params["out_w"][-1], params["out_b"][-1])]
    for idx in range(n - 2, -1, -1):
        H, W = xs[idx].shape[1], xs[idx].shape[2]
        inner_top_down = nearest_resize(last_inner, H, W)
        # fused: lateral 1x1 conv + top-down add in a single kernel pass.
        last_inner = conv1x1(xs[idx], params["inner_w"][idx],
                             params["inner_b"][idx], add=inner_top_down)
        results.append(conv3x3(last_inner, params["out_w"][idx],
                               params["out_b"][idx]))
    results = results[::-1]
    return [jnp.transpose(r, (0, 3, 1, 2)) for r in results]  # back to NCHW


# ------------------------------ pure-JAX reference ---------------------------
def fpn_reference(xs_nchw, params):
    def c1(x, w, b):
        return jnp.einsum("nhwc,cd->nhwd", x, w) + b

    def c3(x, w, b):
        return lax.conv_general_dilated(
            x, w, window_strides=(1, 1), padding="SAME",
            dimension_numbers=("NHWC", "HWIO", "NHWC")) + b

    xs = [jnp.transpose(x, (0, 2, 3, 1)) for x in xs_nchw]
    n = len(xs)
    last_inner = c1(xs[-1], params["inner_w"][-1], params["inner_b"][-1])
    results = [c3(last_inner, params["out_w"][-1], params["out_b"][-1])]
    for idx in range(n - 2, -1, -1):
        latl = c1(xs[idx], params["inner_w"][idx], params["inner_b"][idx])
        td = nearest_resize(last_inner, latl.shape[1], latl.shape[2])
        last_inner = latl + td
        results.append(c3(last_inner, params["out_w"][idx], params["out_b"][idx]))
    results = results[::-1]
    return [jnp.transpose(r, (0, 3, 1, 2)) for r in results]


# ----------------------------------- main ------------------------------------
if __name__ == "__main__":
    key = jax.random.PRNGKey(0)
    kx0, kx1, kp = jax.random.split(key, 3)

    in_channels_list = [4, 8]
    out_channels_list = [4, 8]

    # feature maps from high to low resolution (NCHW, like PyTorch)
    x0 = jax.random.normal(kx0, (2, 4, 16, 16), jnp.float32)
    x1 = jax.random.normal(kx1, (2, 8, 8, 8), jnp.float32)
    xs = [x0, x1]

    params = init_fpn_params(kp, in_channels_list, out_channels_list)

    outs = fpn_forward(xs, params)
    outs = [jax.block_until_ready(o) for o in outs]

    refs = fpn_reference(xs, params)
    for o, r in zip(outs, refs):
        assert o.shape == r.shape, (o.shape, r.shape)
        assert jnp.allclose(o, r, rtol=1e-3, atol=1e-3), float(
            jnp.max(jnp.abs(o - r))
        )

    print("KERNEL_OK")
</pallas_src>

<mosaic_0001>
module attributes {stable_mosaic.version = 11 : i64} {
  func.func @_conv1x1_kernel(%arg0: i32, %arg1: memref<128x8xf32, #tpu.memory_space<vmem>>, %arg2: memref<8x8xf32, #tpu.memory_space<vmem>>, %arg3: memref<1x8xf32, #tpu.memory_space<vmem>>, %arg4: memref<128x8xf32, #tpu.memory_space<vmem>>) attributes {dimension_semantics = [#tpu.dimension_semantics<parallel>], iteration_bounds = array<i64: 1>, scalar_prefetch = 0 : i64, scratch_operands = 0 : i64, tpu.core_type = #tpu.core_type<tc>, window_params = [{transform_indices = @transform_0, window_bounds = array<i64: 128, 8>}, {pipeline_mode = #tpu.pipeline_mode<synchronous>, transform_indices = @transform_1, window_bounds = array<i64: 8, 8>}, {pipeline_mode = #tpu.pipeline_mode<synchronous>, transform_indices = @transform_2, window_bounds = array<i64: 1, 8>}, {transform_indices = @transform_3, window_bounds = array<i64: 128, 8>}]} {
    %c0 = arith.constant 0 : index
    %c0_0 = arith.constant 0 : index
    %0 = vector.load %arg1[%c0, %c0_0] : memref<128x8xf32, #tpu.memory_space<vmem>>, vector<128x8xf32>
    %c0_1 = arith.constant 0 : index
    %c0_2 = arith.constant 0 : index
    %1 = vector.load %arg2[%c0_1, %c0_2] : memref<8x8xf32, #tpu.memory_space<vmem>>, vector<8x8xf32>
    %cst = arith.constant dense<0.000000e+00> : vector<128x8xf32>
    %2 = tpu.matmul %0, %1, %cst {dimension_numbers = #tpu.dot_dimension_numbers<[1], [0], [0], [1], [0, 0, 1, 1], [], []>} : vector<128x8xf32>, vector<8x8xf32>, vector<128x8xf32> -> vector<128x8xf32>
    %c0_3 = arith.constant 0 : index
    %c0_4 = arith.constant 0 : index
    %3 = vector.load %arg3[%c0_3, %c0_4] : memref<1x8xf32, #tpu.memory_space<vmem>>, vector<1x8xf32>
    %4 = vector.broadcast %3 : vector<1x8xf32> to vector<128x8xf32>
    %5 = arith.addf %2, %4 : vector<128x8xf32>
    %c0_5 = arith.constant 0 : index
    %c0_6 = arith.constant 0 : index
    %6 = vector.load %arg4[%c0_5, %c0_6] : memref<128x8xf32, #tpu.memory_space<vmem>>, vector<128x8xf32>
    tpu.vector_store %arg4[%c0_5, %c0_6], %5 {strides = array<i32>} : memref<128x8xf32, #tpu.memory_space<vmem>>, vector<128x8xf32>,
    return
  }
  func.func @transform_0(%arg0: i32) -> (i32, i32) {
    %c0_i32 = arith.constant 0 : i32
    %c0_i32_0 = arith.constant 0 : i32
    return %arg0, %c0_i32 : i32, i32
  }
  func.func @transform_1(%arg0: i32) -> (i32, i32) {
    %c0_i32 = arith.constant 0 : i32
    %c0_i32_0 = arith.constant 0 : i32
    %c0_i32_1 = arith.constant 0 : i32
    return %c0_i32, %c0_i32_0 : i32, i32
  }
  func.func @transform_2(%arg0: i32) -> (i32, i32) {
    %c0_i32 = arith.constant 0 : i32
    %c0_i32_0 = arith.constant 0 : i32
    %c0_i32_1 = arith.constant 0 : i32
    return %c0_i32, %c0_i32_0 : i32, i32
  }
  func.func @transform_3(%arg0: i32) -> (i32, i32) {
    %c0_i32 = arith.constant 0 : i32
    %c0_i32_0 = arith.constant 0 : i32
    return %arg0, %c0_i32 : i32, i32
  }
}

</mosaic_0001>

<bundles_post_ra>
// kernel: tpu_custom_call.1
= control target key start
LH: loop header
LB: loop body
LE: loop exit
PB: predicated region body
PF: predicated region fallthrough
CT: control target
= control target key end

     0   :  { %vm38_vm0 = vcmask 64512   ;;  %s468_s1 = inlined_call_operand.vmem [shape: f32[8,8], index: 1, kind: input, shape index: {}]   ;;  %s469_s0 = inlined_call_operand.vmem [shape: f32[128,8], index: 0, kind: input, shape index: {}]   ;;  %s470_s2 = inlined_call_operand.vmem [shape: f32[1,8], index: 2, kind: input, shape index: {}]   ;;  %s471_s3 = inlined_call_operand.vmem [shape: f32[128,8], index: 3, kind: output, shape index: {}]  }
   0x1   :  { %v30_v0 = vld [vmem:[%s468_s1] sm:$0xff]  ;;  %v15_v3 = vld [vmem:[%s469_s0 + $0x8] sm:$0xff]  ;;  %v16_v5 = vld [vmem:[%s469_s0 + $0x10] sm:$0xff] }
   0x2   :  { %v14_v1 = vld [vmem:[%s469_s0] sm:$0xff]  ;;  %286 = vmatprep.subr.mxu0 %v30_v0  ;;  %312 = vmatprep.subr.mxu1 %v30_v0  ;;  %v23_v4 = vld [vmem:[%s469_s0 + $0x48] sm:$0xff]  ;;  %v24_v6 = vld [vmem:[%s469_s0 + $0x50] sm:$0xff] }
   0x3   :  { %v22_v2 = vld [vmem:[%s469_s0 + $0x40] sm:$0xff]  ;;  %287 = vmatpush3.msra.mxu0 %v30_v0  ;;  %313 = vmatpush3.msra.mxu1 %v30_v0  ;;  %v17_v7 = vld [vmem:[%s469_s0 + $0x18] sm:$0xff]  ;;  %v19_v11 = vld [vmem:[%s469_s0 + $0x28] sm:$0xff] }
   0x4   :  { %288 = vmatprep.mubr.msk.f32.mxu0 %vm38_vm0, %v14_v1  ;;  %300 = vmatprep.mubr.msk.f32.mxu1 %vm38_vm0, %v22_v2  ;;  %v25_v8 = vld [vmem:[%s469_s0 + $0x58] sm:$0xff]  ;;  %v18_v9 = vld [vmem:[%s469_s0 + $0x20] sm:$0xff]  ;;  %v27_v12 = vld [vmem:[%s469_s0 + $0x68] sm:$0xff] }
   0x5   :  { %289 = vmatmul.mubr.msk.f32.vlgmr.msra.gmra.mrb[0].mxu0 %vm38_vm0, %v15_v3  ;;  %301 = vmatmul.mubr.msk.f32.vlgmr.msra.gmra.mrb[0].mxu1 %vm38_vm0, %v23_v4  ;;  %v26_v10 = vld [vmem:[%s469_s0 + $0x60] sm:$0xff]  ;;  %v20_v13 = vld [vmem:[%s469_s0 + $0x30] sm:$0xff]  ;;  %v21_v15 = vld [vmem:[%s469_s0 + $0x38] sm:$0xff] }
   0x6   :  { %291 = vmatprep.mubr.msk.f32.mxu0 %vm38_vm0, %v16_v5  ;;  %303 = vmatprep.mubr.msk.f32.mxu1 %vm38_vm0, %v24_v6  ;;  %v28_v14 = vld [vmem:[%s469_s0 + $0x70] sm:$0xff]  ;;  %v29_v16 = vld [vmem:[%s469_s0 + $0x78] sm:$0xff]  ;;  %v252_v17 = vld [vmem:[%s470_s2] ss:$0 sm:$0xff] }
   0x9   :  { %292 = vmatmul.mubr.msk.f32.gmra.mrb[2].mxu0 %vm38_vm0, %v17_v7  ;;  %304 = vmatmul.mubr.msk.f32.gmra.mrb[2].mxu1 %vm38_vm0, %v25_v8 }
   0xa   :  { %294 = vmatprep.mubr.msk.f32.mxu0 %vm38_vm0, %v18_v9  ;;  %306 = vmatprep.mubr.msk.f32.mxu1 %vm38_vm0, %v26_v10 }
   0xd   :  { %295 = vmatmul.mubr.msk.f32.gmra.mrb[4].mxu0 %vm38_vm0, %v19_v11  ;;  %307 = vmatmul.mubr.msk.f32.gmra.mrb[4].mxu1 %vm38_vm0, %v27_v12 }
   0xe   :  { %297 = vmatprep.mubr.msk.f32.mxu0 %vm38_vm0, %v20_v13  ;;  %309 = vmatprep.mubr.msk.f32.mxu1 %vm38_vm0, %v28_v14 }
  0x11   :  { %298 = vmatmul.mubr.msk.f32.gmra.mrb[6].mxu0 %vm38_vm0, %v21_v15  ;;  %310 = vmatmul.mubr.msk.f32.gmra.mrb[6].mxu1 %vm38_vm0, %v29_v16 }
  0xd8   :  { %v290_v18 = vpop.f32.mrb[0].mxu0  ;;  %v302_v19 = vpop.f32.mrb[0].mxu1 }
  0xd9   :  { %v159_v20 = vadd.f32 %v290_v18, %v252_v17  ;;  %v199_v21 = vadd.f32 %v302_v19, %v252_v17  ;;  %v153_v22 = vpop.f32.mrb[1].mxu0  ;;  %v193_v23 = vpop.f32.mrb[1].mxu1 }
  0xda   :  { %v154_v24 = vadd.f32 %v252_v17, %v153_v22  ;;  %v194_v25 = vadd.f32 %v252_v17, %v193_v23 }
  0xdb   :  { %233 = vst.msk [vmem:[%s471_s3 + $0x8] sm:$0xff] %vm38_vm0, %v159_v20  ;;  %241 = vst.msk [vmem:[%s471_s3 + $0x48] sm:$0xff] %vm38_vm0, %v199_v21 }
  0xdc   :  { %232 = vst.msk [vmem:[%s471_s3] sm:$0xff] %vm38_vm0, %v154_v24  ;;  %240 = vst.msk [vmem:[%s471_s3 + $0x40] sm:$0xff] %vm38_vm0, %v194_v25  ;;  %v293_v26 = vpop.f32.mrb[2].mxu0  ;;  %v305_v27 = vpop.f32.mrb[2].mxu1 }
  0xdd   :  { %v169_v28 = vadd.f32 %v293_v26, %v252_v17  ;;  %v209_v29 = vadd.f32 %v305_v27, %v252_v17  ;;  %v163_v30 = vpop.f32.mrb[3].mxu0  ;;  %v203_v31 = vpop.f32.mrb[3].mxu1 }
  0xde   :  { %v164_v32 = vadd.f32 %v252_v17, %v163_v30  ;;  %v204_v33 = vadd.f32 %v252_v17, %v203_v31 }
  0xdf   :  { %235 = vst.msk [vmem:[%s471_s3 + $0x18] sm:$0xff] %vm38_vm0, %v169_v28  ;;  %243 = vst.msk [vmem:[%s471_s3 + $0x58] sm:$0xff] %vm38_vm0, %v209_v29 }
  0xe0   :  { %234 = vst.msk [vmem:[%s471_s3 + $0x10] sm:$0xff] %vm38_vm0, %v164_v32  ;;  %242 = vst.msk [vmem:[%s471_s3 + $0x50] sm:$0xff] %vm38_vm0, %v204_v33  ;;  %v296_v34 = vpop.f32.mrb[4].mxu0  ;;  %v308_v35 = vpop.f32.mrb[4].mxu1 }
  0xe1   :  { %v179_v36 = vadd.f32 %v296_v34, %v252_v17  ;;  %v219_v37 = vadd.f32 %v308_v35, %v252_v17  ;;  %v173_v38 = vpop.f32.mrb[5].mxu0  ;;  %v213_v39 = vpop.f32.mrb[5].mxu1 }
  0xe2   :  { %v174_v40 = vadd.f32 %v252_v17, %v173_v38  ;;  %v214_v41 = vadd.f32 %v252_v17, %v213_v39 }
  0xe3   :  { %237 = vst.msk [vmem:[%s471_s3 + $0x28] sm:$0xff] %vm38_vm0, %v179_v36  ;;  %245 = vst.msk [vmem:[%s471_s3 + $0x68] sm:$0xff] %vm38_vm0, %v219_v37 }
  0xe4   :  { %236 = vst.msk [vmem:[%s471_s3 + $0x20] sm:$0xff] %vm38_vm0, %v174_v40  ;;  %244 = vst.msk [vmem:[%s471_s3 + $0x60] sm:$0xff] %vm38_vm0, %v214_v41  ;;  %v299_v42 = vpop.f32.mrb[6].mxu0  ;;  %v311_v43 = vpop.f32.mrb[6].mxu1 }
  0xe5   :  { %v189_v44 = vadd.f32 %v299_v42, %v252_v17  ;;  %v229_v45 = vadd.f32 %v311_v43, %v252_v17  ;;  %v183_v46 = vpop.f32.mrb[7].mxu0  ;;  %v223_v47 = vpop.f32.mrb[7].mxu1 }
  0xe6   :  { %v184_v48 = vadd.f32 %v252_v17, %v183_v46  ;;  %v224_v49 = vadd.f32 %v252_v17, %v223_v47 }
  0xe7   :  { %239 = vst.msk [vmem:[%s471_s3 + $0x38] sm:$0xff] %vm38_vm0, %v189_v44  ;;  %247 = vst.msk [vmem:[%s471_s3 + $0x78] sm:$0xff] %vm38_vm0, %v229_v45 }
  0xe8   :  { %238 = vst.msk [vmem:[%s471_s3 + $0x30] sm:$0xff] %vm38_vm0, %v184_v48  ;;  %246 = vst.msk [vmem:[%s471_s3 + $0x70] sm:$0xff] %vm38_vm0, %v224_v49 }

</bundles_post_ra>
